<compile_context>
chip_gen: v6e
topology: v6e:2x2x1
jax: 0.10.0
libtpu: 0.0.40
codegen_flags: <defaults>
</compile_context>

<pallas_src>
import functools

import jax
import jax.numpy as jnp
from jax import lax
from jax.experimental import pallas as pl
from jax.experimental.pallas import tpu as pltpu


# ----------------------------------------------------------------------------
# Kernel
# ----------------------------------------------------------------------------
def _ffn_kernel(x_ref, w1_ref, w3_ref, w2_ref, o_ref, acc_ref):
    """Grid = (row tiles, hidden tiles). Down-projection accumulated over h."""
    h = pl.program_id(1)

    x = x_ref[...]                                              # (tm, dim)

    # Contract against the last axis of the weight tiles (native layout),
    # i.e. x @ W^T without materializing W^T.
    trans_b = (((1,), (1,)), ((), ()))
    h1 = lax.dot_general(x, w1_ref[...], trans_b,
                         preferred_element_type=jnp.float32)    # (tm, th)
    h3 = lax.dot_general(x, w3_ref[...], trans_b,
                         preferred_element_type=jnp.float32)    # (tm, th)

    # SwiGLU gate in f32 (EUP sigmoid + VPU muls).
    g = (h1 * jax.nn.sigmoid(h1)) * h3                          # (tm, th) f32

    # Down projection for this hidden slice (f32 accumulation on the MXU).
    part = lax.dot_general(g.astype(w2_ref.dtype), w2_ref[...], trans_b,
                           preferred_element_type=jnp.float32)  # (tm, dim)

    # Fold the accumulator init into the first hidden step.
    @pl.when(h == 0)
    def _():
        acc_ref[...] = part

    @pl.when(h > 0)
    def _():
        acc_ref[...] += part

    @pl.when(h == pl.num_programs(1) - 1)
    def _():
        o_ref[...] = acc_ref[...].astype(o_ref.dtype)


# ----------------------------------------------------------------------------
# Tile / budget selection helpers
# ----------------------------------------------------------------------------
def _cdiv(a, b):
    return (a + b - 1) // b


def _round_up(n, m):
    return ((n + m - 1) // m) * m


def _tpu_generation():
    try:
        kind = jax.devices()[0].device_kind.lower()
    except Exception:
        return "unknown"
    for g in ("v7", "v6", "v5p", "v5", "v4"):
        if g in kind:
            return g
    return "unknown"


# (tm_target, th_target, vmem_limit_bytes, tensorcores_per_chip)
_GEN_CONFIG = {
    "v7":      (512, 256, 52 * (1 << 20), 2),   # 64 MiB physical VMEM, 2 TCs
    "v6":      (768, 1024, 104 * (1 << 20), 1),
    "v5p":     (512, 512, 96 * (1 << 20), 1),
    "v5":      (256, 1024, 96 * (1 << 20), 1),  # v5e: ridge ~240 flops/byte
    "v4":      (512, 512, 96 * (1 << 20), 1),
    "unknown": (512, 512, 64 * (1 << 20), 1),
}


def _pick_hidden_tile(hidden, requested, align=128):
    """Largest multiple of `align` that divides `hidden` and is <= requested."""
    best = None
    t = align
    cap = min(hidden, max(requested, align))
    while t <= cap:
        if hidden % t == 0:
            best = t
        t += align
    return best if best is not None else hidden


def _vmem_estimate(tm, th, dim, x_bytes, w_bytes, out_bytes):
    """Rough pipeline-buffer + scratch footprint for one tile choice."""
    buf = 2 * tm * dim * x_bytes          # x block (double-buffered)
    buf += 2 * 2 * th * dim * w_bytes     # w1, w3 blocks
    buf += 2 * dim * th * w_bytes         # w2 block
    buf += 2 * tm * dim * out_bytes       # out block
    buf += tm * dim * 4                   # f32 accumulator scratch
    buf += 3 * tm * th * 4                # h1 / h3 / g intermediates (approx)
    return buf


def _select_tiles(M, dim, hidden, x_dtype, w_dtype, tm_req, th_req):
    gen = _tpu_generation()
    tm_target, th_target, vmem_limit, n_tc = _GEN_CONFIG[gen]
    if tm_req is not None:
        tm_target = tm_req
    if th_req is not None:
        th_target = th_req

    itemsize = jnp.dtype(x_dtype).itemsize
    pack = {4: 8, 2: 16, 1: 32}.get(itemsize, 8)

    tm = max(pack, min(_round_up(tm_target, pack), _round_up(M, pack)))
    # Dual-TensorCore chips (v7x): keep at least n_tc row tiles when possible
    # so the "parallel" axis keeps both cores streaming weights.
    if n_tc > 1 and M >= n_tc * pack and _cdiv(M, tm) < n_tc:
        tm = _round_up(_cdiv(M, n_tc), pack)

    th = _pick_hidden_tile(hidden, th_target)

    xb = jnp.dtype(x_dtype).itemsize
    wb = jnp.dtype(w_dtype).itemsize
    budget = vmem_limit - (4 << 20)       # slack for Mosaic internal scratch
    while _vmem_estimate(tm, th, dim, xb, wb, xb) > budget:
        if th > 128:
            th = _pick_hidden_tile(hidden, max(128, th // 2))
        elif tm > pack:
            tm = max(pack, _round_up(tm // 2, pack))
        else:
            break
    return tm, th, vmem_limit


# ----------------------------------------------------------------------------
# Wrapper
# ----------------------------------------------------------------------------
@functools.partial(jax.jit, static_argnames=("tm", "th"))
def feed_forward(x, w1, w2, w3, *, tm=None, th=None):
    """SwiGLU FFN.

    x:  (B, S, dim)
    w1: (hidden, dim)   -- nn.Linear(dim, hidden, bias=False).weight
    w2: (dim, hidden)   -- nn.Linear(hidden, dim, bias=False).weight
    w3: (hidden, dim)   -- nn.Linear(dim, hidden, bias=False).weight
    """
    B, S, dim = x.shape
    hidden = w1.shape[0]
    M = B * S

    # Harden odd hidden sizes: zero-pad the weights once so every hidden tile
    # is full (padded hidden columns contribute exactly zero to the output).
    if hidden % 128 != 0:
        hpad = _round_up(hidden, 128)
        w1 = jnp.pad(w1, ((0, hpad - hidden), (0, 0)))
        w3 = jnp.pad(w3, ((0, hpad - hidden), (0, 0)))
        w2 = jnp.pad(w2, ((0, 0), (0, hpad - hidden)))
        hidden = hpad

    tm_eff, th_eff, vmem_limit = _select_tiles(
        M, dim, hidden, x.dtype, w1.dtype, tm, th)

    # No activation padding: cdiv row grid with a masked partial last tile.
    # Rows are fully independent through the FFN, so padding rows are inert.
    x2d = x.reshape(M, dim)
    n_row_tiles = _cdiv(M, tm_eff)
    grid = (n_row_tiles, hidden // th_eff)

    w_itemsize = jnp.dtype(w1.dtype).itemsize
    x_itemsize = jnp.dtype(x.dtype).itemsize
    cost = pl.CostEstimate(
        flops=int(6 * M * dim * hidden),
        transcendentals=int(M * hidden),
        bytes_accessed=int(
            n_row_tiles * 3 * hidden * dim * w_itemsize   # weights re-streamed
            + M * dim * x_itemsize                        # x read once
            + M * dim * x_itemsize),                      # out written once
    )

    out2d = pl.pallas_call(
        _ffn_kernel,
        out_shape=jax.ShapeDtypeStruct((M, dim), x.dtype),
        grid_spec=pltpu.PrefetchScalarGridSpec(
            num_scalar_prefetch=0,
            grid=grid,
            in_specs=[
                pl.BlockSpec((tm_eff, dim), lambda i, h: (i, 0)),   # x rows
                pl.BlockSpec((th_eff, dim), lambda i, h: (h, 0)),   # W1 slice
                pl.BlockSpec((th_eff, dim), lambda i, h: (h, 0)),   # W3 slice
                pl.BlockSpec((dim, th_eff), lambda i, h: (0, h)),   # W2 slice
            ],
            out_specs=pl.BlockSpec((tm_eff, dim), lambda i, h: (i, 0)),
            scratch_shapes=[pltpu.VMEM((tm_eff, dim), jnp.float32)],
        ),
        compiler_params=pltpu.CompilerParams(
            dimension_semantics=("parallel", "arbitrary"),
            vmem_limit_bytes=int(vmem_limit),
        ),
        cost_estimate=cost,
    )(x2d, w1, w3, w2)

    return out2d.reshape(B, S, dim)


# ----------------------------------------------------------------------------
# Reference + tests
# ----------------------------------------------------------------------------
def _ref_feed_forward(x, w1, w2, w3):
    h1 = jnp.einsum("bsd,hd->bsh", x, w1)
    h3 = jnp.einsum("bsd,hd->bsh", x, w3)
    g = jax.nn.silu(h1) * h3
    return jnp.einsum("bsh,dh->bsd", g, w2)


if __name__ == "__main__":
    key = jax.random.PRNGKey(0)

    # --- Test 1: ModelArgs-equivalent small config -----------------------
    # dim=128, multiple_of=128, ffn_dim_multiplier=None:
    #   hidden = 4*128 = 512 -> int(2*512/3) = 341 -> round up to 384
    batch, seq, dim = 2, 8, 128
    hidden = 384
    kx, k1, k2, k3, key = jax.random.split(key, 5)
    x = jax.random.normal(kx, (batch, seq, dim), dtype=jnp.float32)
    w1 = jax.random.normal(k1, (hidden, dim), dtype=jnp.float32) * 0.02
    w2 = jax.random.normal(k2, (dim, hidden), dtype=jnp.float32) * 0.02
    w3 = jax.random.normal(k3, (hidden, dim), dtype=jnp.float32) * 0.02

    out = jax.block_until_ready(feed_forward(x, w1, w2, w3))
    ref = _ref_feed_forward(x, w1, w2, w3)
    assert out.shape == (batch, seq, dim)
    assert jnp.allclose(out, ref, atol=1e-4, rtol=1e-4), "mismatch (test 1)"

    # --- Test 2: ragged token count (masked partial row tile) + h-accum ---
    batch2, seq2, dim2, hidden2 = 3, 5, 128, 512   # M=15, 2 hidden tiles
    kx, k1, k2, k3, key = jax.random.split(key, 5)
    x2 = jax.random.normal(kx, (batch2, seq2, dim2), dtype=jnp.float32)
    w1b = jax.random.normal(k1, (hidden2, dim2), dtype=jnp.float32) * 0.02
    w2b = jax.random.normal(k2, (dim2, hidden2), dtype=jnp.float32) * 0.02
    w3b = jax.random.normal(k3, (hidden2, dim2), dtype=jnp.float32) * 0.02

    out2 = jax.block_until_ready(feed_forward(x2, w1b, w2b, w3b, th=256))
    ref2 = _ref_feed_forward(x2, w1b, w2b, w3b)
    assert out2.shape == (batch2, seq2, dim2)
    assert jnp.allclose(out2, ref2, atol=1e-4, rtol=1e-4), "mismatch (test 2)"

    # --- Test 3: multiple row tiles with a ragged last tile ---------------
    batch3, seq3, dim3, hidden3 = 1, 37, 256, 512  # 3 row tiles at tm=16
    kx, k1, k2, k3, key = jax.random.split(key, 5)
    x3 = jax.random.normal(kx, (batch3, seq3, dim3), dtype=jnp.float32)
    w1c = jax.random.normal(k1, (hidden3, dim3), dtype=jnp.float32) * 0.02
    w2c = jax.random.normal(k2, (dim3, hidden3), dtype=jnp.float32) * 0.02
    w3c = jax.random.normal(k3, (hidden3, dim3), dtype=jnp.float32) * 0.02

    out3 = jax.block_until_ready(feed_forward(x3, w1c, w2c, w3c, tm=16, th=256))
    ref3 = _ref_feed_forward(x3, w1c, w2c, w3c)
    assert out3.shape == (batch3, seq3, dim3)
    assert jnp.allclose(out3, ref3, atol=1e-4, rtol=1e-4), "mismatch (test 3)"

    print("KERNEL_OK")
</pallas_src>

<mosaic_0001>
module attributes {stable_mosaic.version = 11 : i64} {
  func.func @_ffn_kernel(%arg0: i32, %arg1: i32, %arg2: memref<16x128xf32, #tpu.memory_space<vmem>>, %arg3: memref<384x128xf32, #tpu.memory_space<vmem>>, %arg4: memref<384x128xf32, #tpu.memory_space<vmem>>, %arg5: memref<128x384xf32, #tpu.memory_space<vmem>>, %arg6: memref<16x128xf32, #tpu.memory_space<vmem>>, %arg7: memref<16x128xf32, #tpu.memory_space<vmem>>) attributes {dimension_semantics = [#tpu.dimension_semantics<parallel>, #tpu.dimension_semantics<arbitrary>], iteration_bounds = array<i64: 1, 1>, scalar_prefetch = 0 : i64, scratch_operands = 1 : i64, tpu.core_type = #tpu.core_type<tc>, window_params = [{transform_indices = @transform_0, window_bounds = array<i64: 16, 128>}, {transform_indices = @transform_1, window_bounds = array<i64: 384, 128>}, {transform_indices = @transform_2, window_bounds = array<i64: 384, 128>}, {transform_indices = @transform_3, window_bounds = array<i64: 128, 384>}, {transform_indices = @transform_4, window_bounds = array<i64: 16, 128>}]} {
    %c0 = arith.constant 0 : index
    %c0_0 = arith.constant 0 : index
    %0 = vector.load %arg2[%c0, %c0_0] : memref<16x128xf32, #tpu.memory_space<vmem>>, vector<16x128xf32>
    %c0_1 = arith.constant 0 : index
    %c0_2 = arith.constant 0 : index
    %1 = vector.load %arg3[%c0_1, %c0_2] : memref<384x128xf32, #tpu.memory_space<vmem>>, vector<384x128xf32>
    %cst = arith.constant dense<0.000000e+00> : vector<16x384xf32>
    %2 = tpu.matmul %0, %1, %cst {dimension_numbers = #tpu.dot_dimension_numbers<[1], [1], [0], [0], [0, 0, 1, 0], [], []>} : vector<16x128xf32>, vector<384x128xf32>, vector<16x384xf32> -> vector<16x384xf32>
    %c0_3 = arith.constant 0 : index
    %c0_4 = arith.constant 0 : index
    %3 = vector.load %arg4[%c0_3, %c0_4] : memref<384x128xf32, #tpu.memory_space<vmem>>, vector<384x128xf32>
    %cst_5 = arith.constant dense<0.000000e+00> : vector<16x384xf32>
    %4 = tpu.matmul %0, %3, %cst_5 {dimension_numbers = #tpu.dot_dimension_numbers<[1], [1], [0], [0], [0, 0, 1, 0], [], []>} : vector<16x128xf32>, vector<384x128xf32>, vector<16x384xf32> -> vector<16x384xf32>
    %5 = arith.negf %2 : vector<16x384xf32>
    %6 = math.exp %5 : vector<16x384xf32>
    %cst_6 = arith.constant 1.000000e+00 : f32
    %7 = vector.broadcast %cst_6 : f32 to vector<16x384xf32>
    %8 = arith.addf %7, %6 : vector<16x384xf32>
    %9 = arith.divf %7, %8 : vector<16x384xf32>
    %10 = arith.mulf %2, %9 : vector<16x384xf32>
    %11 = arith.mulf %10, %4 : vector<16x384xf32>
    %c0_7 = arith.constant 0 : index
    %c0_8 = arith.constant 0 : index
    %12 = vector.load %arg5[%c0_7, %c0_8] : memref<128x384xf32, #tpu.memory_space<vmem>>, vector<128x384xf32>
    %cst_9 = arith.constant dense<0.000000e+00> : vector<16x128xf32>
    %13 = tpu.matmul %11, %12, %cst_9 {dimension_numbers = #tpu.dot_dimension_numbers<[1], [1], [0], [0], [0, 0, 1, 0], [], []>} : vector<16x384xf32>, vector<128x384xf32>, vector<16x128xf32> -> vector<16x128xf32>
    %c0_i32 = arith.constant 0 : i32
    %14 = arith.cmpi eq, %arg1, %c0_i32 : i32
    %15 = arith.extui %14 : i1 to i32
    %c0_i32_10 = arith.constant 0 : i32
    %16 = arith.cmpi ne, %15, %c0_i32_10 : i32
    scf.if %16 {
      %c0_15 = arith.constant 0 : index
      %c0_16 = arith.constant 0 : index
      %23 = vector.load %arg7[%c0_15, %c0_16] : memref<16x128xf32, #tpu.memory_space<vmem>>, vector<16x128xf32>
      tpu.vector_store %arg7[%c0_15, %c0_16], %13 {strides = array<i32>} : memref<16x128xf32, #tpu.memory_space<vmem>>, vector<16x128xf32>,
    } else {
    }
    %c0_i32_11 = arith.constant 0 : i32
    %17 = arith.cmpi sgt, %arg1, %c0_i32_11 : i32
    %18 = arith.extui %17 : i1 to i32
    %c0_i32_12 = arith.constant 0 : i32
    %19 = arith.cmpi ne, %18, %c0_i32_12 : i32
    scf.if %19 {
      %c0_15 = arith.constant 0 : index
      %c0_16 = arith.constant 0 : index
      %23 = vector.load %arg7[%c0_15, %c0_16] : memref<16x128xf32, #tpu.memory_space<vmem>>, vector<16x128xf32>
      %24 = arith.addf %23, %13 : vector<16x128xf32>
      %c0_17 = arith.constant 0 : index
      %c0_18 = arith.constant 0 : index
      %25 = vector.load %arg7[%c0_17, %c0_18] : memref<16x128xf32, #tpu.memory_space<vmem>>, vector<16x128xf32>
      tpu.vector_store %arg7[%c0_17, %c0_18], %24 {strides = array<i32>} : memref<16x128xf32, #tpu.memory_space<vmem>>, vector<16x128xf32>,
    } else {
    }
    %c0_i32_13 = arith.constant 0 : i32
    %20 = arith.cmpi eq, %arg1, %c0_i32_13 : i32
    %21 = arith.extui %20 : i1 to i32
    %c0_i32_14 = arith.constant 0 : i32
    %22 = arith.cmpi ne, %21, %c0_i32_14 : i32
    scf.if %22 {
      %c0_15 = arith.constant 0 : index
      %c0_16 = arith.constant 0 : index
      %23 = vector.load %arg7[%c0_15, %c0_16] : memref<16x128xf32, #tpu.memory_space<vmem>>, vector<16x128xf32>
      %c0_17 = arith.constant 0 : index
      %c0_18 = arith.constant 0 : index
      %24 = vector.load %arg6[%c0_17, %c0_18] : memref<16x128xf32, #tpu.memory_space<vmem>>, vector<16x128xf32>
      tpu.vector_store %arg6[%c0_17, %c0_18], %23 {strides = array<i32>} : memref<16x128xf32, #tpu.memory_space<vmem>>, vector<16x128xf32>,
    } else {
    }
    return
  }
  func.func @transform_0(%arg0: i32, %arg1: i32) -> (i32, i32) {
    %c0_i32 = arith.constant 0 : i32
    %c0_i32_0 = arith.constant 0 : i32
    return %arg0, %c0_i32 : i32, i32
  }
  func.func @transform_1(%arg0: i32, %arg1: i32) -> (i32, i32) {
    %c0_i32 = arith.constant 0 : i32
    %c0_i32_0 = arith.constant 0 : i32
    return %arg1, %c0_i32 : i32, i32
  }
  func.func @transform_2(%arg0: i32, %arg1: i32) -> (i32, i32) {
    %c0_i32 = arith.constant 0 : i32
    %c0_i32_0 = arith.constant 0 : i32
    return %arg1, %c0_i32 : i32, i32
  }
  func.func @transform_3(%arg0: i32, %arg1: i32) -> (i32, i32) {
    %c0_i32 = arith.constant 0 : i32
    %c0_i32_0 = arith.constant 0 : i32
    return %c0_i32, %arg1 : i32, i32
  }
  func.func @transform_4(%arg0: i32, %arg1: i32) -> (i32, i32) {
    %c0_i32 = arith.constant 0 : i32
    %c0_i32_0 = arith.constant 0 : i32
    return %arg0, %c0_i32 : i32, i32
  }
}

</mosaic_0001>

<bundles_post_ra>
// kernel: feed_forward.1
= control target key start
LH: loop header
LB: loop body
LE: loop exit
PB: predicated region body
PF: predicated region fallthrough
CT: control target
= control target key end

     0   :  { %9 = vsyncpa [#allocation4], 0  ;;  %s1218_s0 = inlined_call_operand.hbm [shape: f32[16,128], index: 0, kind: input, shape index: {}]   ;;  %s1219_s1 = inlined_call_operand.hbm [shape: f32[384,128], index: 1, kind: input, shape index: {}]   ;;  %s1220_s2 = inlined_call_operand.hbm [shape: f32[384,128], index: 2, kind: input, shape index: {}]   ;;  %s1221_s3 = inlined_call_operand.hbm [shape: f32[128,384], index: 3, kind: input, shape index: {}]   ;;  %s1222_s4 = inlined_call_operand.hbm [shape: f32[16,128], index: 4, kind: output, shape index: {}]  }
   0x1   :  { %10 = vsyncpa [#allocation7], 0 }
   0x2   :  { %11 = vsyncpa [#allocation10], 0 }
   0x3   :  { %12 = vsyncpa [#allocation5], 0  ;;  %s1141_s15 = smov [#allocation6]   ;;  %s1142_s17 = smov [#allocation3]  }
   0x4   :  { %s30_s16 = sshll.u32 %s1141_s15, 4  ;;  %s18_s18 = sshll.u32 %s1142_s17, 4  ;;  %s31_s16 = int_to_ptr.vmem [resolvable:$true] %s30_s16  ;;  %s19_s18 = int_to_ptr.vmem [resolvable:$true] %s18_s18 }
   0x5   :  { %s1041_s19 = scalar_lea.vmem %s31_s16, 6144  ;;  %p1046_p1 = scmp.lt.s32.totalorder %s31_s16, %s31_s16 }
   0x6   :  { %p1042_p0 = scmp.ne.s32.totalorder %s31_s16, %s1041_s19  ;;  %p1047_p2 = scmp.lt.s32.totalorder %s1041_s19, %s1041_s19 }
   0x8   :  { %p1048_p3 = por %p1047_p2, %p1046_p1 }
   0xa   :  { %p1049_p4 = pnand %p1048_p3, %p1042_p0 }
   0xc   :  { %1052 = shalt.err (!%p1049_p4)
}
   0xd   :  { %s1143_s20 = smov 128   ;;  %s1144_s21 = smov 8  }
   0xe   :  { %36 = dma.hbm_to_vmem [thread:$0]  %s1219_s1, 6144, %s31_s16, [#allocation7], %s1143_s20, %s1143_s20, %s1144_s21  }
   0xf   :  { %s1061_s24 = scalar_lea.vmem %s19_s18, 256  ;;  %p1066_p6 = scmp.lt.s32.totalorder %s19_s18, %s19_s18 }
  0x10   :  { %p1062_p5 = scmp.ne.s32.totalorder %s19_s18, %s1061_s24  ;;  %p1067_p7 = scmp.lt.s32.totalorder %s1061_s24, %s1061_s24 }
  0x12   :  { %p1068_p8 = por %p1067_p7, %p1066_p6 }
  0x14   :  { %p1069_p9 = pnand %p1068_p8, %p1062_p5 }
  0x16   :  { %1072 = shalt.err (!%p1069_p9)
}
  0x17   :  { %24 = dma.hbm_to_vmem [thread:$0]  %s1218_s0, 256, %s19_s18, [#allocation4], %s1143_s20, %s1143_s20, %s1144_s21  }
  0x18   :  { %s1145_s27 = smov [#allocation8]   ;;  %s1146_s29 = smov [#allocation9]  }
  0x19   :  { %s42_s28 = sshll.u32 %s1145_s27, 4  ;;  %s54_s30 = sshll.u32 %s1146_s29, 4  ;;  %s43_s28 = int_to_ptr.vmem [resolvable:$true] %s42_s28  ;;  %s55_s30 = int_to_ptr.vmem [resolvable:$true] %s54_s30 }
  0x1a   :  { %s1081_s1 = scalar_lea.vmem %s43_s28, 6144  ;;  %p1086_p11 = scmp.lt.s32.totalorder %s43_s28, %s43_s28 }
  0x1b   :  { %p1082_p10 = scmp.ne.s32.totalorder %s43_s28, %s1081_s1  ;;  %p1087_p12 = scmp.lt.s32.totalorder %s1081_s1, %s1081_s1 }
  0x1d   :  { %p1088_p13 = por %p1087_p12, %p1086_p11 }
  0x1f   :  { %p1089_p0 = pnand %p1088_p13, %p1082_p10 }
  0x21   :  { %1092 = shalt.err (!%p1089_p0)
}
  0x22   :  { %48 = dma.hbm_to_vmem [thread:$0]  %s1220_s2, 6144, %s43_s28, [#allocation7], %s1143_s20, %s1143_s20, %s1144_s21  }
  0x23   :  { %s1101_s0 = scalar_lea.vmem %s55_s30, 6144  ;;  %p1106_p2 = scmp.lt.s32.totalorder %s55_s30, %s55_s30 }
  0x24   :  { %p1102_p1 = scmp.ne.s32.totalorder %s55_s30, %s1101_s0  ;;  %p1107_p3 = scmp.lt.s32.totalorder %s1101_s0, %s1101_s0 }
  0x26   :  { %p1108_p4 = por %p1107_p3, %p1106_p2 }
  0x28   :  { %p1109_p5 = pnand %p1108_p4, %p1102_p1 }
  0x2a   :  { %1112 = shalt.err (!%p1109_p5)
}
  0x2b   :  { %s1147_s7 = smov 384   ;;  %s1148_s8 = smov 24  }
  0x2c   :  { %60 = dma.hbm_to_vmem [thread:$0]  %s1221_s3, 6144, %s55_s30, [#allocation10], %s1147_s7, %s1147_s7, %s1148_s8  }
  0x2d   :  { %1133 = dma.done.wait [#allocation4], 256  }
  0x2e   :  { %1134 = vsyncadd [#allocation4], 4294967040 }
  0x2f   :  { %1135 = dma.done.wait [#allocation7], 12288  }
  0x30   :  { %1136 = vsyncadd [#allocation7], 4294955008 }
  0x31   :  { %1137 = dma.done.wait [#allocation10], 6144  }
  0x32   :  { %1138 = vsyncadd [#allocation10], 4294961152  ;;  %v106_v0 = vld [vmem:[#allocation6 + $0xf8] sm:$0xff]  ;;  %v105_v3 = vld [vmem:[#allocation6 + $0xf0] sm:$0xff]  ;;  %s1149_s2 = smov [#allocation11]  }
  0x33   :  { %v122_v1 = vld [vmem:[#allocation6 + $0x178] sm:$0xff]  ;;  %769 = vmatprep.subr.mxu0 %v106_v0  ;;  %v121_v4 = vld [vmem:[#allocation6 + $0x170] sm:$0xff]  ;;  %v104_v6 = vld [vmem:[#allocation6 + $0xe8] sm:$0xff]  ;;  %s749_s3 = sshll.u32 %s1149_s2, 4  ;;  %s750_s3 = int_to_ptr.vmem [resolvable:$true] %s749_s3 }
  0x34   :  { %v90_v2 = vld [vmem:[#allocation6 + $0x78] sm:$0xff]  ;;  %895 = vmatprep.subr.mxu1 %v122_v1  ;;  %v89_v5 = vld [vmem:[#allocation6 + $0x70] sm:$0xff]  ;;  %v120_v7 = vld [vmem:[#allocation6 + $0x168] sm:$0xff]  ;;  %s1113_s11 = scalar_lea.vmem %s750_s3, 256  ;;  %p1118_p7 = scmp.lt.s32.totalorder %s750_s3, %s750_s3 }
  0x35   :  { %770 = vmatpush3.xpose.msra.mxu0 %v90_v2  ;;  %896 = vmatpush3.xpose.msra.mxu1 %v122_v1  ;;  %v88_v8 = vld [vmem:[#allocation6 + $0x68] sm:$0xff]  ;;  %v103_v9 = vld [vmem:[#allocation6 + $0xe0] sm:$0xff]  ;;  %v102_v12 = vld [vmem:[#allocation6 + $0xd8] sm:$0xff]  ;;  %p1114_p6 = scmp.ne.s32.totalorder %s750_s3, %s1113_s11  ;;  %p1119_p8 = scmp.lt.s32.totalorder %s1113_s11, %s1113_s11 }
  0x36   :  { %771 = vmatprep.subr.mxu0 %v105_v3  ;;  %897 = vmatprep.subr.mxu1 %v121_v4  ;;  %v119_v10 = vld [vmem:[#allocation6 + $0x160] sm:$0xff]  ;;  %v118_v13 = vld [vmem:[#allocation6 + $0x158] sm:$0xff]  ;;  %v101_v15 = vld [vmem:[#allocation6 + $0xd0] sm:$0xff] }
  0x37   :  { %v87_v11 = vld [vmem:[#allocation6 + $0x60] sm:$0xff]  ;;  %v86_v14 = vld [vmem:[#allocation6 + $0x58] sm:$0xff]  ;;  %v117_v16 = vld [vmem:[#allocation6 + $0x150] sm:$0xff]  ;;  %p1120_p9 = por %p1119_p8, %p1118_p7 }
  0x38   :  { %v1196_v17 = vld [vmem:[#allocation3] sm:$0xff]  ;;  %v100_v19 = vld [vmem:[#allocation6 + $0xc8] sm:$0xff]  ;;  %v99_v22 = vld [vmem:[#allocation6 + $0xc0] sm:$0xff] }
  0x39   :  { %772 = vmatpush3.xpose.msra.mxu0 %v89_v5  ;;  %898 = vmatpush3.xpose.msra.mxu1 %v121_v4  ;;  %v85_v18 = vld [vmem:[#allocation6 + $0x50] sm:$0xff]  ;;  %v116_v20 = vld [vmem:[#allocation6 + $0x148] sm:$0xff]  ;;  %v115_v23 = vld [vmem:[#allocation6 + $0x140] sm:$0xff]  ;;  %p1121_p10 = pnand %p1120_p9, %p1114_p6 }
  0x3a   :  { %773 = vmatprep.subr.mxu0 %v104_v6  ;;  %899 = vmatprep.subr.mxu1 %v120_v7  ;;  %v84_v21 = vld [vmem:[#allocation6 + $0x48] sm:$0xff]  ;;  %v83_v24 = vld [vmem:[#allocation6 + $0x40] sm:$0xff]  ;;  %v98_v25 = vld [vmem:[#allocation6 + $0xb8] sm:$0xff] }
  0x3b   :  { %801 = vmatprep.mubr.f32.mxu0 %v1196_v17  ;;  %927 = vmatprep.mubr.f32.mxu1 %v1196_v17  ;;  %v114_v26 = vld [vmem:[#allocation6 + $0x138] sm:$0xff]  ;;  %v97_v28 = vld [vmem:[#allocation6 + $0xb0] sm:$0xff]  ;;  %v96_v31 = vld [vmem:[#allocation6 + $0xa8] sm:$0xff] }
  0x3c   :  { %v82_v27 = vld [vmem:[#allocation6 + $0x38] sm:$0xff]  ;;  %v113_v29 = vld [vmem:[#allocation6 + $0x130] sm:$0xff]  ;;  %v112_v32 = vld [vmem:[#allocation6 + $0x128] sm:$0xff] }
  0x3d   :  { %774 = vmatpush3.xpose.msra.mxu0 %v88_v8  ;;  %900 = vmatpush3.xpose.msra.mxu1 %v120_v7  ;;  %v81_v30 = vld [vmem:[#allocation6 + $0x30] sm:$0xff]  ;;  %v80_v33 = vld [vmem:[#allocation6 + $0x28] sm:$0xff]  ;;  %v95_v34 = vld [vmem:[#allocation6 + $0xa0] sm:$0xff] }
  0x3e   :  { %775 = vmatprep.subr.mxu0 %v103_v9  ;;  %901 = vmatprep.subr.mxu1 %v119_v10  ;;  %v111_v35 = vld [vmem:[#allocation6 + $0x120] sm:$0xff]  ;;  %v94_v37 = vld [vmem:[#allocation6 + $0x98] sm:$0xff]  ;;  %v93_v40 = vld [vmem:[#allocation6 + $0x90] sm:$0xff] }
  0x3f   :  { %v79_v36 = vld [vmem:[#allocation6 + $0x20] sm:$0xff]  ;;  %v110_v38 = vld [vmem:[#allocation6 + $0x118] sm:$0xff]  ;;  %v109_v41 = vld [vmem:[#allocation6 + $0x110] sm:$0xff] }
  0x40   :  { %v78_v39 = vld [vmem:[#allocation6 + $0x18] sm:$0xff]  ;;  %v77_v42 = vld [vmem:[#allocation6 + $0x10] sm:$0xff]  ;;  %v92_v43 = vld [vmem:[#allocation6 + $0x88] sm:$0xff] }
  0x41   :  { %776 = vmatpush3.xpose.msra.mxu0 %v87_v11  ;;  %902 = vmatpush3.xpose.msra.mxu1 %v119_v10  ;;  %v108_v44 = vld [vmem:[#allocation6 + $0x108] sm:$0xff]  ;;  %v91_v46 = vld [vmem:[#allocation6 + $0x80] sm:$0xff]  ;;  %v306_v49 = vld [vmem:[#allocation8 + $0xf8] sm:$0xff] }
  0x42   :  { %777 = vmatprep.subr.mxu0 %v102_v12  ;;  %903 = vmatprep.subr.mxu1 %v118_v13  ;;  %v76_v45 = vld [vmem:[#allocation6 + $0x8] sm:$0xff]  ;;  %v107_v47 = vld [vmem:[#allocation6 + $0x100] sm:$0xff]  ;;  %v322_v50 = vld [vmem:[#allocation8 + $0x178] sm:$0xff] }
  0x43   :  { %v75_v48 = vld [vmem:[#allocation6] sm:$0xff]  ;;  %v1200_v51 = vld [vmem:[#allocation3 + $0x8] sm:$0xff]  ;;  %v305_v53 = vld [vmem:[#allocation8 + $0xf0] sm:$0xff] }
  0x44   :  { %v290_v52 = vld [vmem:[#allocation8 + $0x78] sm:$0xff]  ;;  %v321_v54 = vld [vmem:[#allocation8 + $0x170] sm:$0xff]  ;;  %v304_v56 = vld [vmem:[#allocation8 + $0xe8] sm:$0xff] }
  0x45   :  { %778 = vmatpush3.xpose.msra.mxu0 %v86_v14  ;;  %904 = vmatpush3.xpose.msra.mxu1 %v118_v13  ;;  %v289_v55 = vld [vmem:[#allocation8 + $0x70] sm:$0xff]  ;;  %v320_v57 = vld [vmem:[#allocation8 + $0x168] sm:$0xff]  ;;  %v303_v59 = vld [vmem:[#allocation8 + $0xe0] sm:$0xff] }
  0x46   :  { %779 = vmatprep.subr.mxu0 %v101_v15  ;;  %905 = vmatprep.subr.mxu1 %v117_v16  ;;  %v288_v58 = vld [vmem:[#allocation8 + $0x68] sm:$0xff]  ;;  %v319_v60 = vld [vmem:[#allocation8 + $0x160] sm:$0xff]  ;;  %v302_v62 = vld [vmem:[#allocation8 + $0xd8] sm:$0xff] }
  0x47   :  { %v287_v61 = vld [vmem:[#allocation8 + $0x60] sm:$0xff]  ;;  %v318_v63 = vld [vmem:[#allocation8 + $0x158] sm:$0xff]  ;;  %v301_v1 = vld [vmem:[#allocation8 + $0xd0] sm:$0xff] }
  0x48   :  { %v286_v0 = vld [vmem:[#allocation8 + $0x58] sm:$0xff]  ;;  %v317_v2 = vld [vmem:[#allocation8 + $0x150] sm:$0xff]  ;;  %v300_v4 = vld [vmem:[#allocation8 + $0xc8] sm:$0xff] }
  0x49   :  { %780 = vmatpush3.xpose.msra.mxu0 %v85_v18  ;;  %906 = vmatpush3.xpose.msra.mxu1 %v117_v16  ;;  %v285_v3 = vld [vmem:[#allocation8 + $0x50] sm:$0xff]  ;;  %v316_v5 = vld [vmem:[#allocation8 + $0x148] sm:$0xff]  ;;  %v299_v7 = vld [vmem:[#allocation8 + $0xc0] sm:$0xff] }
  0x4a   :  { %781 = vmatprep.subr.mxu0 %v100_v19  ;;  %907 = vmatprep.subr.mxu1 %v116_v20  ;;  %v284_v6 = vld [vmem:[#allocation8 + $0x48] sm:$0xff]  ;;  %v315_v8 = vld [vmem:[#allocation8 + $0x140] sm:$0xff]  ;;  %v298_v10 = vld [vmem:[#allocation8 + $0xb8] sm:$0xff] }
  0x4b   :  { %v283_v9 = vld [vmem:[#allocation8 + $0x40] sm:$0xff]  ;;  %v314_v11 = vld [vmem:[#allocation8 + $0x138] sm:$0xff]  ;;  %v297_v13 = vld [vmem:[#allocation8 + $0xb0] sm:$0xff] }
  0x4c   :  { %v282_v12 = vld [vmem:[#allocation8 + $0x38] sm:$0xff]  ;;  %v313_v14 = vld [vmem:[#allocation8 + $0x130] sm:$0xff]  ;;  %v296_v16 = vld [vmem:[#allocation8 + $0xa8] sm:$0xff] }
  0x4d   :  { %782 = vmatpush3.xpose.msra.mxu0 %v84_v21  ;;  %908 = vmatpush3.xpose.msra.mxu1 %v116_v20  ;;  %v281_v15 = vld [vmem:[#allocation8 + $0x30] sm:$0xff]  ;;  %v312_v18 = vld [vmem:[#allocation8 + $0x128] sm:$0xff]  ;;  %v295_v20 = vld [vmem:[#allocation8 + $0xa0] sm:$0xff] }
  0x4e   :  { %783 = vmatprep.subr.mxu0 %v99_v22  ;;  %909 = vmatprep.subr.mxu1 %v115_v23  ;;  %v280_v19 = vld [vmem:[#allocation8 + $0x28] sm:$0xff]  ;;  %v311_v21 = vld [vmem:[#allocation8 + $0x120] sm:$0xff] }
  0x4f   :  { %v279_v22 = vld [vmem:[#allocation8 + $0x20] sm:$0xff] }
  0x51   :  { %784 = vmatpush3.xpose.msra.mxu0 %v83_v24  ;;  %910 = vmatpush3.xpose.msra.mxu1 %v115_v23  ;;  %v294_v23 = vld [vmem:[#allocation8 + $0x98] sm:$0xff] }
  0x52   :  { %785 = vmatprep.subr.mxu0 %v98_v25  ;;  %911 = vmatprep.subr.mxu1 %v114_v26  ;;  %v310_v24 = vld [vmem:[#allocation8 + $0x118] sm:$0xff] }
  0x53   :  { %v278_v25 = vld [vmem:[#allocation8 + $0x18] sm:$0xff] }
  0x55   :  { %786 = vmatpush3.xpose.msra.mxu0 %v82_v27  ;;  %912 = vmatpush3.xpose.msra.mxu1 %v114_v26  ;;  %v293_v26 = vld [vmem:[#allocation8 + $0x90] sm:$0xff] }
  0x56   :  { %787 = vmatprep.subr.mxu0 %v97_v28  ;;  %913 = vmatprep.subr.mxu1 %v113_v29  ;;  %v309_v27 = vld [vmem:[#allocation8 + $0x110] sm:$0xff] }
  0x57   :  { %v277_v28 = vld [vmem:[#allocation8 + $0x10] sm:$0xff] }
  0x59   :  { %788 = vmatpush3.xpose.msra.mxu0 %v81_v30  ;;  %914 = vmatpush3.xpose.msra.mxu1 %v113_v29  ;;  %v292_v29 = vld [vmem:[#allocation8 + $0x88] sm:$0xff] }
  0x5a   :  { %789 = vmatprep.subr.mxu0 %v96_v31  ;;  %915 = vmatprep.subr.mxu1 %v112_v32  ;;  %v308_v30 = vld [vmem:[#allocation8 + $0x108] sm:$0xff] }
  0x5b   :  { %v276_v31 = vld [vmem:[#allocation8 + $0x8] sm:$0xff] }
  0x5d   :  { %790 = vmatpush3.xpose.msra.mxu0 %v80_v33  ;;  %916 = vmatpush3.xpose.msra.mxu1 %v112_v32  ;;  %v291_v32 = vld [vmem:[#allocation8 + $0x80] sm:$0xff] }
  0x5e   :  { %791 = vmatprep.subr.mxu0 %v95_v34  ;;  %917 = vmatprep.subr.mxu1 %v111_v35  ;;  %v307_v33 = vld [vmem:[#allocation8 + $0x100] sm:$0xff] }
  0x5f   :  { %v275_v34 = vld [vmem:[#allocation8] sm:$0xff] }
  0x61   :  { %792 = vmatpush3.xpose.msra.mxu0 %v79_v36  ;;  %918 = vmatpush3.xpose.msra.mxu1 %v111_v35  ;;  %v569_v35 = vld [vmem:[#allocation9 + $0x170] sm:$0xff]  ;;  %v570_v36 = vld [vmem:[#allocation9 + $0x178] sm:$0xff] }
  0x62   :  { %793 = vmatprep.subr.mxu0 %v94_v37  ;;  %919 = vmatprep.subr.mxu1 %v110_v38  ;;  %v568_v37 = vld [vmem:[#allocation9 + $0x168] sm:$0xff] }
  0x65   :  { %794 = vmatpush3.xpose.msra.mxu0 %v78_v39  ;;  %920 = vmatpush3.xpose.msra.mxu1 %v110_v38  ;;  %v566_v38 = vld [vmem:[#allocation9 + $0x158] sm:$0xff]  ;;  %v567_v39 = vld [vmem:[#allocation9 + $0x160] sm:$0xff] }
  0x66   :  { %795 = vmatprep.subr.mxu0 %v93_v40  ;;  %921 = vmatprep.subr.mxu1 %v109_v41  ;;  %v565_v40 = vld [vmem:[#allocation9 + $0x150] sm:$0xff] }
  0x69   :  { %796 = vmatpush3.xpose.msra.mxu0 %v77_v42  ;;  %922 = vmatpush3.xpose.msra.mxu1 %v109_v41  ;;  %v564_v41 = vld [vmem:[#allocation9 + $0x148] sm:$0xff]  ;;  %v562_v42 = vld [vmem:[#allocation9 + $0x138] sm:$0xff] }
  0x6a   :  { %797 = vmatprep.subr.mxu0 %v92_v43  ;;  %923 = vmatprep.subr.mxu1 %v108_v44  ;;  %v560_v43 = vld [vmem:[#allocation9 + $0x128] sm:$0xff] }
  0x6d   :  { %798 = vmatpush3.xpose.msra.mxu0 %v76_v45  ;;  %924 = vmatpush3.xpose.msra.mxu1 %v108_v44  ;;  %v561_v44 = vld [vmem:[#allocation9 + $0x130] sm:$0xff]  ;;  %v559_v45 = vld [vmem:[#allocation9 + $0x120] sm:$0xff] }
  0x6e   :  { %799 = vmatprep.subr.mxu0 %v91_v46  ;;  %925 = vmatprep.subr.mxu1 %v107_v47  ;;  %v557_v46 = vld [vmem:[#allocation9 + $0x110] sm:$0xff] }
  0x71   :  { %800 = vmatpush3.xpose.msra.mxu0 %v75_v48  ;;  %926 = vmatpush3.xpose.msra.mxu1 %v107_v47  ;;  %v558_v47 = vld [vmem:[#allocation9 + $0x118] sm:$0xff]  ;;  %v556_v48 = vld [vmem:[#allocation9 + $0x108] sm:$0xff] }
  0x72   :  { %823 = vmatprep.subr.mxu0 %v306_v49  ;;  %930 = vmatprep.subr.mxu1 %v322_v50  ;;  %v554_v49 = vld [vmem:[#allocation9 + $0xf8] sm:$0xff] }
  0x74   :  { %802 = vmatmul.mubr.f32.vlgmr.msra.gmra.mxu0 %v1196_v17  ;;  %928 = vmatmul.mubr.f32.vlgmr.msra.gmra.mxu1 %v1200_v51 }
  0x75   :  { %824 = vmatpush3.xpose.msra.mxu0 %v290_v52  ;;  %931 = vmatpush3.xpose.msra.mxu1 %v322_v50  ;;  %v555_v50 = vld [vmem:[#allocation9 + $0x100] sm:$0xff] }
  0x76   :  { %803 = vmatprep.mubr.f32.mxu0 %v1200_v51  ;;  %825 = vmatprep.subr.mxu0 %v305_v53  ;;  %v551_v52 = vld [vmem:[#allocation9 + $0xe0] sm:$0xff]  ;;  %v552_v53 = vld [vmem:[#allocation9 + $0xe8] sm:$0xff] }
  0x77   :  { %932 = vmatprep.subr.mxu1 %v321_v54  ;;  %962 = vmatprep.mubr.f32.mxu1 %v1196_v17 }
  0x78   :  { %804 = vmatmul.mubr.f32.gmra.mxu0 %v1200_v51 }
  0x79   :  { %826 = vmatpush3.xpose.msra.mxu0 %v289_v55  ;;  %933 = vmatpush3.xpose.msra.mxu1 %v321_v54  ;;  %v550_v54 = vld [vmem:[#allocation9 + $0xd8] sm:$0xff]  ;;  %v548_v55 = vld [vmem:[#allocation9 + $0xc8] sm:$0xff] }
  0x7a   :  { %827 = vmatprep.subr.mxu0 %v304_v56  ;;  %934 = vmatprep.subr.mxu1 %v320_v57  ;;  %v549_v56 = vld [vmem:[#allocation9 + $0xd0] sm:$0xff] }
  0x7b   :  { %855 = vmatprep.mubr.f32.mxu0 %v1196_v17 }
  0x7d   :  { %828 = vmatpush3.xpose.msra.mxu0 %v288_v58  ;;  %935 = vmatpush3.xpose.msra.mxu1 %v320_v57  ;;  %v547_v57 = vld [vmem:[#allocation9 + $0xc0] sm:$0xff]  ;;  %v545_v58 = vld [vmem:[#allocation9 + $0xb0] sm:$0xff] }
  0x7e   :  { %829 = vmatprep.subr.mxu0 %v303_v59  ;;  %936 = vmatprep.subr.mxu1 %v319_v60  ;;  %v546_v59 = vld [vmem:[#allocation9 + $0xb8] sm:$0xff] }
  0x81   :  { %830 = vmatpush3.xpose.msra.mxu0 %v287_v61  ;;  %937 = vmatpush3.xpose.msra.mxu1 %v319_v60  ;;  %v544_v60 = vld [vmem:[#allocation9 + $0xa8] sm:$0xff]  ;;  %v542_v61 = vld [vmem:[#allocation9 + $0x98] sm:$0xff] }
  0x82   :  { %831 = vmatprep.subr.mxu0 %v302_v62  ;;  %938 = vmatprep.subr.mxu1 %v318_v63  ;;  %v543_v62 = vld [vmem:[#allocation9 + $0xa0] sm:$0xff] }
  0x85   :  { %832 = vmatpush3.xpose.msra.mxu0 %v286_v0  ;;  %939 = vmatpush3.xpose.msra.mxu1 %v318_v63  ;;  %v541_v63 = vld [vmem:[#allocation9 + $0x90] sm:$0xff]  ;;  %v539_v0 = vld [vmem:[#allocation9 + $0x80] sm:$0xff] }
  0x86   :  { %833 = vmatprep.subr.mxu0 %v301_v1  ;;  %940 = vmatprep.subr.mxu1 %v317_v2  ;;  %v540_v1 = vld [vmem:[#allocation9 + $0x88] sm:$0xff] }
  0x89   :  { %834 = vmatpush3.xpose.msra.mxu0 %v285_v3  ;;  %941 = vmatpush3.xpose.msra.mxu1 %v317_v2  ;;  %v538_v2 = vld [vmem:[#allocation9 + $0x78] sm:$0xff]  ;;  %v536_v3 = vld [vmem:[#allocation9 + $0x68] sm:$0xff] }
  0x8a   :  { %835 = vmatprep.subr.mxu0 %v300_v4  ;;  %942 = vmatprep.subr.mxu1 %v316_v5  ;;  %v537_v4 = vld [vmem:[#allocation9 + $0x70] sm:$0xff] }
  0x8d   :  { %836 = vmatpush3.xpose.msra.mxu0 %v284_v6  ;;  %943 = vmatpush3.xpose.msra.mxu1 %v316_v5  ;;  %v535_v5 = vld [vmem:[#allocation9 + $0x60] sm:$0xff]  ;;  %v533_v6 = vld [vmem:[#allocation9 + $0x50] sm:$0xff] }
  0x8e   :  { %837 = vmatprep.subr.mxu0 %v299_v7  ;;  %944 = vmatprep.subr.mxu1 %v315_v8  ;;  %v534_v7 = vld [vmem:[#allocation9 + $0x58] sm:$0xff] }
  0x91   :  { %838 = vmatpush3.xpose.msra.mxu0 %v283_v9  ;;  %945 = vmatpush3.xpose.msra.mxu1 %v315_v8  ;;  %v532_v8 = vld [vmem:[#allocation9 + $0x48] sm:$0xff]  ;;  %v530_v9 = vld [vmem:[#allocation9 + $0x38] sm:$0xff] }
  0x92   :  { %839 = vmatprep.subr.mxu0 %v298_v10  ;;  %946 = vmatprep.subr.mxu1 %v314_v11  ;;  %v531_v10 = vld [vmem:[#allocation9 + $0x40] sm:$0xff] }
  0x95   :  { %840 = vmatpush3.xpose.msra.mxu0 %v282_v12  ;;  %947 = vmatpush3.xpose.msra.mxu1 %v314_v11  ;;  %v529_v11 = vld [vmem:[#allocation9 + $0x30] sm:$0xff]  ;;  %v527_v12 = vld [vmem:[#allocation9 + $0x20] sm:$0xff] }
  0x96   :  { %841 = vmatprep.subr.mxu0 %v297_v13  ;;  %948 = vmatprep.subr.mxu1 %v313_v14  ;;  %v528_v13 = vld [vmem:[#allocation9 + $0x28] sm:$0xff] }
  0x99   :  { %842 = vmatpush3.xpose.msra.mxu0 %v281_v15  ;;  %949 = vmatpush3.xpose.msra.mxu1 %v313_v14  ;;  %v526_v14 = vld [vmem:[#allocation9 + $0x18] sm:$0xff]  ;;  %v524_v15 = vld [vmem:[#allocation9 + $0x8] sm:$0xff] }
  0x9a   :  { %843 = vmatprep.subr.mxu0 %v296_v16  ;;  %950 = vmatprep.subr.mxu1 %v312_v18  ;;  %v525_v16 = vld [vmem:[#allocation9 + $0x10] sm:$0xff] }
  0x9d   :  { %844 = vmatpush3.xpose.msra.mxu0 %v280_v19  ;;  %951 = vmatpush3.xpose.msra.mxu1 %v312_v18  ;;  %v523_v18 = vld [vmem:[#allocation9] sm:$0xff] }
  0x9e   :  { %845 = vmatprep.subr.mxu0 %v295_v20  ;;  %952 = vmatprep.subr.mxu1 %v311_v21 }
  0xa1   :  { %846 = vmatpush3.xpose.msra.mxu0 %v279_v22  ;;  %953 = vmatpush3.xpose.msra.mxu1 %v311_v21 }
  0xa2   :  { %847 = vmatprep.subr.mxu0 %v294_v23  ;;  %954 = vmatprep.subr.mxu1 %v310_v24 }
  0xa5   :  { %848 = vmatpush3.xpose.msra.mxu0 %v278_v25  ;;  %955 = vmatpush3.xpose.msra.mxu1 %v310_v24 }
  0xa6   :  { %849 = vmatprep.subr.mxu0 %v293_v26  ;;  %956 = vmatprep.subr.mxu1 %v309_v27 }
  0xa9   :  { %850 = vmatpush3.xpose.msra.mxu0 %v277_v28  ;;  %957 = vmatpush3.xpose.msra.mxu1 %v309_v27 }
  0xaa   :  { %851 = vmatprep.subr.mxu0 %v292_v29  ;;  %958 = vmatprep.subr.mxu1 %v308_v30 }
  0xad   :  { %852 = vmatpush3.xpose.msra.mxu0 %v276_v31  ;;  %959 = vmatpush3.xpose.msra.mxu1 %v308_v30 }
  0xae   :  { %853 = vmatprep.subr.mxu0 %v291_v32  ;;  %960 = vmatprep.subr.mxu1 %v307_v33 }
  0xb1   :  { %854 = vmatpush3.xpose.msra.mxu0 %v275_v34  ;;  %961 = vmatpush3.xpose.msra.mxu1 %v307_v33 }
  0xb2   :  { %571 = vmatprep.subr.mxu0 %v569_v35  ;;  %965 = vmatprep.subr.mxu1 %v570_v36 }
  0xb4   :  { %856 = vmatmul.mubr.f32.vlgmr.msra.gmra.mxu0 %v1196_v17  ;;  %963 = vmatmul.mubr.f32.vlgmr.msra.gmra.mxu1 %v1200_v51  ;;  %v563_v17 = vld [vmem:[#allocation9 + $0x140] sm:$0xff] }
  0xb5   :  { %857 = vmatprep.mubr.f32.mxu0 %v1200_v51  ;;  %572 = vmatpush1.xpose.msra.mxu0 %v568_v37 }
  0xb6   :  { %966 = vmatpush3.xpose.msra.mxu1 %v570_v36  ;;  %573 = vmatprep.subr.mxu0 %v566_v38 }
  0xb7   :  { %967 = vmatprep.subr.mxu1 %v567_v39 }
  0xb8   :  { %858 = vmatmul.mubr.f32.gmra.mxu0 %v1200_v51  ;;  %v553_v51 = vld [vmem:[#allocation9 + $0xf0] sm:$0xff] }
  0xb9   :  { %574 = vmatpush1.xpose.msra.mxu0 %v565_v40 }
  0xba   :  { %968 = vmatpush3.xpose.msra.mxu1 %v567_v39  ;;  %575 = vmatprep.subr.mxu0 %v563_v17 }
  0xbb   :  { %969 = vmatprep.subr.mxu1 %v564_v41 }
  0xbd   :  { %576 = vmatpush1.xpose.msra.mxu0 %v562_v42 }
  0xbe   :  { %970 = vmatpush3.xpose.msra.mxu1 %v564_v41  ;;  %577 = vmatprep.subr.mxu0 %v560_v43 }
  0xbf   :  { %971 = vmatprep.subr.mxu1 %v561_v44 }
  0xc1   :  { %578 = vmatpush1.xpose.msra.mxu0 %v559_v45 }
  0xc2   :  { %972 = vmatpush3.xpose.msra.mxu1 %v561_v44  ;;  %579 = vmatprep.subr.mxu0 %v557_v46 }
  0xc3   :  { %973 = vmatprep.subr.mxu1 %v558_v47 }
  0xc5   :  { %580 = vmatpush1.xpose.msra.mxu0 %v556_v48 }
  0xc6   :  { %974 = vmatpush3.xpose.msra.mxu1 %v558_v47  ;;  %581 = vmatprep.subr.mxu0 %v554_v49 }
  0xc7   :  { %975 = vmatprep.subr.mxu1 %v555_v50 }
  0xc9   :  { %582 = vmatpush1.xpose.msra.mxu0 %v553_v51 }
  0xca   :  { %976 = vmatpush3.xpose.msra.mxu1 %v555_v50  ;;  %583 = vmatprep.subr.mxu0 %v551_v52 }
  0xcb   :  { %977 = vmatprep.subr.mxu1 %v552_v53 }
  0xcd   :  { %584 = vmatpush1.xpose.msra.mxu0 %v550_v54 }
  0xce   :  { %978 = vmatpush3.xpose.msra.mxu1 %v552_v53  ;;  %585 = vmatprep.subr.mxu0 %v548_v55 }
  0xcf   :  { %979 = vmatprep.subr.mxu1 %v549_v56 }
  0xd1   :  { %586 = vmatpush1.xpose.msra.mxu0 %v547_v57 }
  0xd2   :  { %980 = vmatpush3.xpose.msra.mxu1 %v549_v56  ;;  %587 = vmatprep.subr.mxu0 %v545_v58 }
  0xd3   :  { %981 = vmatprep.subr.mxu1 %v546_v59 }
  0xd5   :  { %588 = vmatpush1.xpose.msra.mxu0 %v544_v60 }
  0xd6   :  { %982 = vmatpush3.xpose.msra.mxu1 %v546_v59  ;;  %589 = vmatprep.subr.mxu0 %v542_v61 }
  0xd7   :  { %983 = vmatprep.subr.mxu1 %v543_v62 }
  0xd9   :  { %590 = vmatpush1.xpose.msra.mxu0 %v541_v63 }
  0xda   :  { %984 = vmatpush3.xpose.msra.mxu1 %v543_v62  ;;  %591 = vmatprep.subr.mxu0 %v539_v0 }
  0xdb   :  { %985 = vmatprep.subr.mxu1 %v540_v1 }
  0xdd   :  { %592 = vmatpush1.xpose.msra.mxu0 %v538_v2 }
  0xde   :  { %986 = vmatpush3.xpose.msra.mxu1 %v540_v1  ;;  %593 = vmatprep.subr.mxu0 %v536_v3 }
  0xdf   :  { %987 = vmatprep.subr.mxu1 %v537_v4 }
  0xe1   :  { %594 = vmatpush1.xpose.msra.mxu0 %v535_v5 }
  0xe2   :  { %988 = vmatpush3.xpose.msra.mxu1 %v537_v4  ;;  %595 = vmatprep.subr.mxu0 %v533_v6 }
  0xe3   :  { %989 = vmatprep.subr.mxu1 %v534_v7 }
  0xe5   :  { %596 = vmatpush1.xpose.msra.mxu0 %v532_v8 }
  0xe6   :  { %990 = vmatpush3.xpose.msra.mxu1 %v534_v7  ;;  %597 = vmatprep.subr.mxu0 %v530_v9 }
  0xe7   :  { %991 = vmatprep.subr.mxu1 %v531_v10 }
  0xe9   :  { %598 = vmatpush1.xpose.msra.mxu0 %v529_v11 }
  0xea   :  { %992 = vmatpush3.xpose.msra.mxu1 %v531_v10  ;;  %599 = vmatprep.subr.mxu0 %v527_v12 }
  0xeb   :  { %993 = vmatprep.subr.mxu1 %v528_v13 }
  0xed   :  { %600 = vmatpush1.xpose.msra.mxu0 %v526_v14 }
  0xee   :  { %994 = vmatpush3.xpose.msra.mxu1 %v528_v13  ;;  %601 = vmatprep.subr.mxu0 %v524_v15 }
  0xef   :  { %995 = vmatprep.subr.mxu1 %v525_v16 }
  0xf1   :  { %602 = vmatpush1.xpose.msra.mxu0 %v523_v18 }
  0xf2   :  { %996 = vmatpush3.xpose.msra.mxu1 %v525_v16 }
 0x134   :  { %v189_v19 = vpop.f32.mrf.mxu0  ;;  %v929_v20 = vpop.f32.mrf.mxu1 }
 0x135   :  { %v763_v24 = vmul.f32 -1.442695, %v189_v19  ;;  %v768_v27 = vmul.f32 -1.442695, %v929_v20 }
 0x136   :  { %v191_v21 = vpop.f32.mrf.mxu0  ;;  %v266_v22 = vpop.f32.mrf.mxu1 }
 0x137   :  { %v764_v25 = vmul.f32 -1.442695, %v191_v21  ;;  %v765_v26 = vmul.f32 -1.442695, %v266_v22  ;;  %1009 = vpow2.f32 %v763_v24 }
 0x138   :  { %v195_v23 = vpop.f32.mrf.mxu0 }
 0x139   :  { %1011 = vpow2.f32 %v764_v25  ;;  %v766_v30 = vmul.f32 -1.442695, %v195_v23 }
 0x13a   :  { %v197_v28 = vpop.f32.mrf.mxu0  ;;  %1013 = vpow2.f32 %v765_v26 }
 0x13b   :  { %v767_v29 = vmul.f32 -1.442695, %v197_v28  ;;  %1015 = vpow2.f32 %v768_v27 }
 0x13d   :  { %1017 = vpow2.f32 %v767_v29 }
 0x13e   :  { %1019 = vpow2.f32 %v766_v30 }
 0x144   :  { %v1010_v31 = vpop.eup %1009 }
 0x145   :  { %v493_v35 = vadd.f32 1.0, %v1010_v31 }
 0x146   :  { %v1012_v32 = vpop.eup %1011 }
 0x147   :  { %v1014_v33 = vpop.eup %1013  ;;  %v494_v36 = vadd.f32 1.0, %v1012_v32  ;;  %1021 = vrcp.f32 %v493_v35 }
 0x148   :  { %v1016_v34 = vpop.eup %1015  ;;  %v495_v37 = vadd.f32 1.0, %v1014_v33 }
 0x149   :  { %v498_v39 = vadd.f32 1.0, %v1016_v34  ;;  %1023 = vrcp.f32 %v494_v36 }
 0x14a   :  { %v1018_v38 = vpop.eup %1017  ;;  %1025 = vrcp.f32 %v495_v37 }
 0x14b   :  { %v1020_v40 = vpop.eup %1019  ;;  %v497_v17 = vadd.f32 1.0, %v1018_v38  ;;  %1027 = vrcp.f32 %v498_v39 }
 0x14c   :  { %v496_v41 = vadd.f32 1.0, %v1020_v40 }
 0x14d   :  { %1029 = vrcp.f32 %v497_v17 }
 0x14e   :  { %1031 = vrcp.f32 %v496_v41 }
 0x154   :  { %v1022_v42 = vpop.eup %1021 }
 0x155   :  { %v511_v51 = vmul.f32 %v1022_v42, %v189_v19 }
 0x156   :  { %v1024_v43 = vpop.eup %1023 }
 0x157   :  { %v1026_v44 = vpop.eup %1025  ;;  %v512_v48 = vmul.f32 %v1024_v43, %v191_v21 }
 0x158   :  { %v1028_v45 = vpop.eup %1027  ;;  %v513_v49 = vmul.f32 %v1026_v44, %v266_v22 }
 0x159   :  { %v516_v52 = vmul.f32 %v1028_v45, %v929_v20 }
 0x15a   :  { %v1030_v50 = vpop.eup %1029 }
 0x15b   :  { %v1032_v55 = vpop.eup %1031  ;;  %v515_v61 = vmul.f32 %v1030_v50, %v197_v28 }
 0x15c   :  { %v514_v62 = vmul.f32 %v1032_v55, %v195_v23 }
 0x174   :  { %v389_v46 = vpop.f32.mrf.mxu0  ;;  %v964_v47 = vpop.f32.mrf.mxu1 }
 0x175   :  { %v517_v58 = vmul.f32 %v511_v51, %v389_v46  ;;  %v522_v59 = vmul.f32 %v964_v47, %v516_v52 }
 0x176   :  { %v391_v53 = vpop.f32.mrf.mxu0  ;;  %v466_v54 = vpop.f32.mrf.mxu1 }
 0x177   :  { %v518_v56 = vmul.f32 %v512_v48, %v391_v53  ;;  %v519_v57 = vmul.f32 %v513_v49, %v466_v54 }
 0x178   :  { %v395_v60 = vpop.f32.mrf.mxu0 }
 0x179   :  { %635 = vmatprep.mubr.f32.mxu0 %v518_v56  ;;  %997 = vmatprep.mubr.f32.mxu1 %v519_v57  ;;  %v520_v1 = vmul.f32 %v514_v62, %v395_v60 }
 0x17a   :  { %v397_v63 = vpop.f32.mrf.mxu0  ;;  %636 = vmatmul.mubr.f32.vlgmr.msra.gmra.mxu0 %v517_v58  ;;  %998 = vmatmul.mubr.f32.vlgmr.msra.gmra.mxu1 %v522_v59 }
 0x17b   :  { %v521_v0 = vmul.f32 %v515_v61, %v397_v63 }
 0x17d   :  { %640 = vmatprep.mubr.f32.mxu0 %v521_v0 }
 0x17e   :  { %641 = vmatmul.mubr.f32.gmra.mxu0 %v520_v1 }
 0x23a   :  { %v637_v2 = vpop.f32.mrf.mxu0  ;;  %v999_v3 = vpop.f32.mrf.mxu1 }
 0x23c   :  { %v639_v4 = vpop.f32.mrf.mxu0  ;;  %v712_v5 = vpop.f32.mrf.mxu1 }
 0x23d   :  { %v713_v6 = vadd.f32 %v712_v5, %v637_v2 }
 0x23e   :  { %v642_v7 = vpop.f32.mrf.mxu0 }
 0x23f   :  { %742 = vst [vmem:[#allocation11] sm:$0xff] %v713_v6  ;;  %v718_v8 = vadd.f32 %v999_v3, %v642_v7 }
 0x240   :  { %v644_v9 = vpop.f32.mrf.mxu0 }
 0x241   :  { %743 = vst [vmem:[#allocation11 + $0x8] sm:$0xff] %v718_v8 }
 0x242   :  { %1124 = shalt.err (!%p1121_p10)
}
 0x243   :  { %755 = dma.vmem_to_hbm [thread:$0]  %s750_s3, 256, %s1222_s4, [#allocation5], %s1143_s20, %s1143_s20, %s1144_s21  }
 0x244   :  { %1139 = dma.done.wait [#allocation5], 256  }
 0x245   :  { %1140 = vsyncadd [#allocation5], 4294967040 }
 0x246   :  { %759 = vsyncpa [#allocation4], 1 }
 0x247   :  { %760 = vsyncpa [#allocation7], 1 }
 0x248   :  { %761 = vsyncpa [#allocation10], 1 }
 0x249   :  { %762 = vsyncpa [#allocation5], 1 }

</bundles_post_ra>
